<compile_context>
chip_gen: v5e
topology: v5e:2x2
jax: 0.10.0
libtpu: 0.0.40
codegen_flags: <defaults>
</compile_context>

<pallas_src>
import functools

import jax
import jax.numpy as jnp
from jax.experimental import pallas as pl
from jax.experimental.pallas import tpu as pltpu

LANES = 128
SUBLANES = 8
MAX_TILE_ROWS = 1024       # 1024 x 128 f32 = 512 KiB / input tile (x2 buffers)
SMOOTH = 1e-5


def _mixed_loss_kernel(p_ref, t_ref, out_ref, acc_ref, *,
                       rows, block_rows, steps_per_core, needs_mask):
    """Accumulates per-lane partial sums of (p-t)^2, p*t, p, t in VMEM.

    Grid = (num_splits [parallel], steps_per_core [arbitrary/reduction]).
    On the last reduction step each split writes its (4, 8, 128) partials to
    its own lane-dense output block.
    """
    c = pl.program_id(0)
    i = pl.program_id(1)

    @pl.when(i == 0)
    def _():
        acc_ref[...] = jnp.zeros_like(acc_ref)

    p = p_ref[...].astype(jnp.float32)
    t = t_ref[...].astype(jnp.float32)

    if needs_mask:
        # Zero out rows that fall past the logical end of the flattened data
        # (ragged last block / fully out-of-range blocks of the 2-way split).
        start_row = (c * steps_per_core + i) * block_rows
        row_ids = start_row + jax.lax.broadcasted_iota(
            jnp.int32, (block_rows, LANES), 0)
        valid = row_ids < rows
        zero = jnp.zeros_like(p)
        p = jnp.where(valid, p, zero)
        t = jnp.where(valid, t, zero)

    d = p - t
    nsub = block_rows // SUBLANES

    def fold(x):
        # (block_rows, 128) -> (8, 128) via VPU adds across vregs (no XLU).
        return jnp.sum(x.reshape(nsub, SUBLANES, LANES), axis=0)

    acc_ref[0] += fold(d * d)     # sum of squared error
    acc_ref[1] += fold(p * t)     # intersection
    acc_ref[2] += fold(p)         # sum(predicted)
    acc_ref[3] += fold(t)         # sum(target)

    @pl.when(i == pl.num_programs(1) - 1)
    def _():
        out_ref[...] = acc_ref[...][None]


def mixed_loss(predicted, target, *, weight_nll=1.0, weight_dice=1.0,
               weight_jaccard=1.0):
    assert predicted.shape == target.shape
    n_elem = predicted.size

    # Row-major flatten is free; only pad when numel is not a multiple of
    # 8*128 (rare for image tensors; the in-kernel mask handles block-level
    # raggedness, this pad only rounds the flat view up to whole sublanes).
    chunk = SUBLANES * LANES
    p_flat = predicted.reshape(-1)
    t_flat = target.reshape(-1)
    padded = pl.cdiv(n_elem, chunk) * chunk
    pad = padded - n_elem
    if pad:
        p_flat = jnp.pad(p_flat, (0, pad))
        t_flat = jnp.pad(t_flat, (0, pad))
    rows = padded // LANES
    p2d = p_flat.reshape(rows, LANES)
    t2d = t_flat.reshape(rows, LANES)

    block_rows = min(MAX_TILE_ROWS, rows)          # multiple of 8 by construction
    steps_total = pl.cdiv(rows, block_rows)
    num_splits = 2 if steps_total >= 2 else 1      # megacore split (v7x)
    steps_per_core = pl.cdiv(steps_total, num_splits)
    needs_mask = (num_splits * steps_per_core * block_rows) != rows

    def in_index_map(c, i):
        blk = c * steps_per_core + i
        if needs_mask:
            # Clamp so no block starts past the array; masked to zero in-kernel.
            blk = jnp.minimum(blk, steps_total - 1)
        return (blk, 0)

    kernel = functools.partial(
        _mixed_loss_kernel,
        rows=rows,
        block_rows=block_rows,
        steps_per_core=steps_per_core,
        needs_mask=needs_mask,
    )

    partials = pl.pallas_call(
        kernel,
        out_shape=jax.ShapeDtypeStruct((num_splits, 4, SUBLANES, LANES),
                                       jnp.float32),
        grid_spec=pltpu.PrefetchScalarGridSpec(
            num_scalar_prefetch=0,
            grid=(num_splits, steps_per_core),
            in_specs=[
                pl.BlockSpec((block_rows, LANES), in_index_map),
                pl.BlockSpec((block_rows, LANES), in_index_map),
            ],
            out_specs=pl.BlockSpec((1, 4, SUBLANES, LANES),
                                   lambda c, i: (c, 0, 0, 0)),
            scratch_shapes=[pltpu.VMEM((4, SUBLANES, LANES), jnp.float32)],
        ),
        compiler_params=pltpu.CompilerParams(
            dimension_semantics=("parallel", "arbitrary")),
    )(p2d, t2d)

    # Tiny final combine (4 * 8 * 128 * num_splits values) in plain JAX.
    sums = jnp.sum(partials, axis=(0, 2, 3))
    sq_err, inter, sum_p, sum_t = sums[0], sums[1], sums[2], sums[3]

    mse = sq_err / n_elem
    dice = (2.0 * inter + SMOOTH) / (sum_p + sum_t + SMOOTH)
    jaccard = (inter + SMOOTH) / (sum_p + sum_t - inter + SMOOTH)

    return (weight_nll * mse
            + weight_dice * (1.0 - dice)
            + weight_jaccard * (1.0 - jaccard))


def mixed_loss_ref(predicted, target, *, weight_nll=1.0, weight_dice=1.0,
                   weight_jaccard=1.0):
    p = predicted.astype(jnp.float32)
    t = target.astype(jnp.float32)
    mse = jnp.mean((p - t) ** 2)
    inter = jnp.sum(p * t)
    sum_p = jnp.sum(p)
    sum_t = jnp.sum(t)
    dice = (2.0 * inter + SMOOTH) / (sum_p + sum_t + SMOOTH)
    jaccard = (inter + SMOOTH) / (sum_p + sum_t - inter + SMOOTH)
    return (weight_nll * mse + weight_dice * (1.0 - dice)
            + weight_jaccard * (1.0 - jaccard))


if __name__ == "__main__":
    key = jax.random.PRNGKey(0)
    k1, k2 = jax.random.split(key)
    # NCHW, small shapes: batch=2, channels=4, spatial=16x16
    shape = (2, 4, 16, 16)
    predicted = jax.random.uniform(k1, shape, dtype=jnp.float32)
    target = (jax.random.uniform(k2, shape, dtype=jnp.float32) > 0.5
              ).astype(jnp.float32)

    out = mixed_loss(predicted, target)
    out = jax.block_until_ready(out)

    ref = mixed_loss_ref(predicted, target)
    assert jnp.allclose(out, ref, rtol=1e-5, atol=1e-5), (out, ref)
    print("KERNEL_OK")
</pallas_src>

<mosaic_0001>
module attributes {stable_mosaic.version = 11 : i64} {
  func.func @_mixed_loss_kernel(%arg0: i32, %arg1: i32, %arg2: memref<16x128xf32, #tpu.memory_space<vmem>>, %arg3: memref<16x128xf32, #tpu.memory_space<vmem>>, %arg4: memref<1x4x8x128xf32, #tpu.memory_space<vmem>>, %arg5: memref<4x8x128xf32, #tpu.memory_space<vmem>>) attributes {dimension_semantics = [#tpu.dimension_semantics<parallel>, #tpu.dimension_semantics<arbitrary>], iteration_bounds = array<i64: 1, 1>, scalar_prefetch = 0 : i64, scratch_operands = 1 : i64, tpu.core_type = #tpu.core_type<tc>, window_params = [{transform_indices = @transform_0, window_bounds = array<i64: 16, 128>}, {transform_indices = @transform_1, window_bounds = array<i64: 16, 128>}, {transform_indices = @transform_2, window_bounds = array<i64: 1, 4, 8, 128>}]} {
    %c0_i32 = arith.constant 0 : i32
    %0 = arith.cmpi eq, %arg1, %c0_i32 : i32
    %1 = arith.extui %0 : i1 to i32
    %c0_i32_0 = arith.constant 0 : i32
    %2 = arith.cmpi ne, %1, %c0_i32_0 : i32
    scf.if %2 {
      %cst_30 = arith.constant 0.000000e+00 : f32
      %43 = vector.broadcast %cst_30 : f32 to vector<4x8x128xf32>
      %c0_31 = arith.constant 0 : index
      %c0_32 = arith.constant 0 : index
      %c0_33 = arith.constant 0 : index
      %44 = vector.load %arg5[%c0_31, %c0_32, %c0_33] : memref<4x8x128xf32, #tpu.memory_space<vmem>>, vector<4x8x128xf32>
      tpu.vector_store %arg5[%c0_31, %c0_32, %c0_33], %43 {strides = array<i32>} : memref<4x8x128xf32, #tpu.memory_space<vmem>>, vector<4x8x128xf32>,
    } else {
    }
    %c0 = arith.constant 0 : index
    %c0_1 = arith.constant 0 : index
    %3 = vector.load %arg2[%c0, %c0_1] : memref<16x128xf32, #tpu.memory_space<vmem>>, vector<16x128xf32>
    %c0_2 = arith.constant 0 : index
    %c0_3 = arith.constant 0 : index
    %4 = vector.load %arg3[%c0_2, %c0_3] : memref<16x128xf32, #tpu.memory_space<vmem>>, vector<16x128xf32>
    %5 = arith.subf %3, %4 : vector<16x128xf32>
    %c0_4 = arith.constant 0 : index
    %c0_5 = arith.constant 0 : index
    %c0_6 = arith.constant 0 : index
    %6 = vector.load %arg5[%c0_4, %c0_5, %c0_6] : memref<4x8x128xf32, #tpu.memory_space<vmem>>, vector<1x8x128xf32>
    %7 = vector.shape_cast %6 : vector<1x8x128xf32> to vector<8x128xf32>
    %8 = arith.mulf %5, %5 : vector<16x128xf32>
    %9 = vector.shape_cast %8 : vector<16x128xf32> to vector<2x8x128xf32>
    %cst = arith.constant dense<0.000000e+00> : vector<8x128xf32>
    %10 = vector.multi_reduction <add>, %9, %cst [0] : vector<2x8x128xf32> to vector<8x128xf32>
    %11 = arith.addf %7, %10 : vector<8x128xf32>
    %c0_7 = arith.constant 0 : index
    %c0_8 = arith.constant 0 : index
    %c0_9 = arith.constant 0 : index
    %12 = vector.load %arg5[%c0_7, %c0_8, %c0_9] : memref<4x8x128xf32, #tpu.memory_space<vmem>>, vector<1x8x128xf32>
    %13 = vector.shape_cast %12 : vector<1x8x128xf32> to vector<8x128xf32>
    %14 = vector.shape_cast %11 : vector<8x128xf32> to vector<1x8x128xf32>
    tpu.vector_store %arg5[%c0_7, %c0_8, %c0_9], %14 {strides = array<i32>} : memref<4x8x128xf32, #tpu.memory_space<vmem>>, vector<1x8x128xf32>,
    %c1 = arith.constant 1 : index
    %c0_10 = arith.constant 0 : index
    %c0_11 = arith.constant 0 : index
    %15 = vector.load %arg5[%c1, %c0_10, %c0_11] : memref<4x8x128xf32, #tpu.memory_space<vmem>>, vector<1x8x128xf32>
    %16 = vector.shape_cast %15 : vector<1x8x128xf32> to vector<8x128xf32>
    %17 = arith.mulf %3, %4 : vector<16x128xf32>
    %18 = vector.shape_cast %17 : vector<16x128xf32> to vector<2x8x128xf32>
    %cst_12 = arith.constant dense<0.000000e+00> : vector<8x128xf32>
    %19 = vector.multi_reduction <add>, %18, %cst_12 [0] : vector<2x8x128xf32> to vector<8x128xf32>
    %20 = arith.addf %16, %19 : vector<8x128xf32>
    %c1_13 = arith.constant 1 : index
    %c0_14 = arith.constant 0 : index
    %c0_15 = arith.constant 0 : index
    %21 = vector.load %arg5[%c1_13, %c0_14, %c0_15] : memref<4x8x128xf32, #tpu.memory_space<vmem>>, vector<1x8x128xf32>
    %22 = vector.shape_cast %21 : vector<1x8x128xf32> to vector<8x128xf32>
    %23 = vector.shape_cast %20 : vector<8x128xf32> to vector<1x8x128xf32>
    tpu.vector_store %arg5[%c1_13, %c0_14, %c0_15], %23 {strides = array<i32>} : memref<4x8x128xf32, #tpu.memory_space<vmem>>, vector<1x8x128xf32>,
    %c2 = arith.constant 2 : index
    %c0_16 = arith.constant 0 : index
    %c0_17 = arith.constant 0 : index
    %24 = vector.load %arg5[%c2, %c0_16, %c0_17] : memref<4x8x128xf32, #tpu.memory_space<vmem>>, vector<1x8x128xf32>
    %25 = vector.shape_cast %24 : vector<1x8x128xf32> to vector<8x128xf32>
    %26 = vector.shape_cast %3 : vector<16x128xf32> to vector<2x8x128xf32>
    %cst_18 = arith.constant dense<0.000000e+00> : vector<8x128xf32>
    %27 = vector.multi_reduction <add>, %26, %cst_18 [0] : vector<2x8x128xf32> to vector<8x128xf32>
    %28 = arith.addf %25, %27 : vector<8x128xf32>
    %c2_19 = arith.constant 2 : index
    %c0_20 = arith.constant 0 : index
    %c0_21 = arith.constant 0 : index
    %29 = vector.load %arg5[%c2_19, %c0_20, %c0_21] : memref<4x8x128xf32, #tpu.memory_space<vmem>>, vector<1x8x128xf32>
    %30 = vector.shape_cast %29 : vector<1x8x128xf32> to vector<8x128xf32>
    %31 = vector.shape_cast %28 : vector<8x128xf32> to vector<1x8x128xf32>
    tpu.vector_store %arg5[%c2_19, %c0_20, %c0_21], %31 {strides = array<i32>} : memref<4x8x128xf32, #tpu.memory_space<vmem>>, vector<1x8x128xf32>,
    %c3 = arith.constant 3 : index
    %c0_22 = arith.constant 0 : index
    %c0_23 = arith.constant 0 : index
    %32 = vector.load %arg5[%c3, %c0_22, %c0_23] : memref<4x8x128xf32, #tpu.memory_space<vmem>>, vector<1x8x128xf32>
    %33 = vector.shape_cast %32 : vector<1x8x128xf32> to vector<8x128xf32>
    %34 = vector.shape_cast %4 : vector<16x128xf32> to vector<2x8x128xf32>
    %cst_24 = arith.constant dense<0.000000e+00> : vector<8x128xf32>
    %35 = vector.multi_reduction <add>, %34, %cst_24 [0] : vector<2x8x128xf32> to vector<8x128xf32>
    %36 = arith.addf %33, %35 : vector<8x128xf32>
    %c3_25 = arith.constant 3 : index
    %c0_26 = arith.constant 0 : index
    %c0_27 = arith.constant 0 : index
    %37 = vector.load %arg5[%c3_25, %c0_26, %c0_27] : memref<4x8x128xf32, #tpu.memory_space<vmem>>, vector<1x8x128xf32>
    %38 = vector.shape_cast %37 : vector<1x8x128xf32> to vector<8x128xf32>
    %39 = vector.shape_cast %36 : vector<8x128xf32> to vector<1x8x128xf32>
    tpu.vector_store %arg5[%c3_25, %c0_26, %c0_27], %39 {strides = array<i32>} : memref<4x8x128xf32, #tpu.memory_space<vmem>>, vector<1x8x128xf32>,
    %c0_i32_28 = arith.constant 0 : i32
    %40 = arith.cmpi eq, %arg1, %c0_i32_28 : i32
    %41 = arith.extui %40 : i1 to i32
    %c0_i32_29 = arith.constant 0 : i32
    %42 = arith.cmpi ne, %41, %c0_i32_29 : i32
    scf.if %42 {
      %c0_30 = arith.constant 0 : index
      %c0_31 = arith.constant 0 : index
      %c0_32 = arith.constant 0 : index
      %43 = vector.load %arg5[%c0_30, %c0_31, %c0_32] : memref<4x8x128xf32, #tpu.memory_space<vmem>>, vector<4x8x128xf32>
      %44 = vector.shape_cast %43 : vector<4x8x128xf32> to vector<1x4x8x128xf32>
      %c0_33 = arith.constant 0 : index
      %c0_34 = arith.constant 0 : index
      %c0_35 = arith.constant 0 : index
      %c0_36 = arith.constant 0 : index
      %45 = vector.load %arg4[%c0_33, %c0_34, %c0_35, %c0_36] : memref<1x4x8x128xf32, #tpu.memory_space<vmem>>, vector<1x4x8x128xf32>
      tpu.vector_store %arg4[%c0_33, %c0_34, %c0_35, %c0_36], %44 {strides = array<i32>} : memref<1x4x8x128xf32, #tpu.memory_space<vmem>>, vector<1x4x8x128xf32>,
    } else {
    }
    return
  }
  func.func @transform_0(%arg0: i32, %arg1: i32) -> (i32, i32) {
    %c1_i32 = arith.constant 1 : i32
    %0 = arith.muli %arg0, %c1_i32 : i32
    %1 = arith.addi %0, %arg1 : i32
    %c0_i32 = arith.constant 0 : i32
    %c0_i32_0 = arith.constant 0 : i32
    return %1, %c0_i32 : i32, i32
  }
  func.func @transform_1(%arg0: i32, %arg1: i32) -> (i32, i32) {
    %c1_i32 = arith.constant 1 : i32
    %0 = arith.muli %arg0, %c1_i32 : i32
    %1 = arith.addi %0, %arg1 : i32
    %c0_i32 = arith.constant 0 : i32
    %c0_i32_0 = arith.constant 0 : i32
    return %1, %c0_i32 : i32, i32
  }
  func.func @transform_2(%arg0: i32, %arg1: i32) -> (i32, i32, i32, i32) {
    %c0_i32 = arith.constant 0 : i32
    %c0_i32_0 = arith.constant 0 : i32
    %c0_i32_1 = arith.constant 0 : i32
    %c0_i32_2 = arith.constant 0 : i32
    return %arg0, %c0_i32, %c0_i32_0, %c0_i32_1 : i32, i32, i32, i32
  }
}

</mosaic_0001>

<bundles_post_ra>
// kernel: tpu_custom_call.1
= control target key start
LH: loop header
LB: loop body
LE: loop exit
PB: predicated region body
PF: predicated region fallthrough
CT: control target
= control target key end

     0   :  { %7 = vsyncpa [#allocation4], 0  ;;  %s245_s0 = inlined_call_operand.hbm [shape: f32[16,128], index: 0, kind: input, shape index: {}]   ;;  %s246_s1 = inlined_call_operand.hbm [shape: f32[16,128], index: 1, kind: input, shape index: {}]   ;;  %s247_s2 = inlined_call_operand.hbm [shape: f32[1,4,8,128], index: 2, kind: output, shape index: {}]  }
   0x1   :  { %8 = vsyncpa [#allocation7], 0 }
   0x2   :  { %9 = vsyncpa [#allocation5], 0  ;;  %s18_s11 = sshll.u32 %s245_s0, 4  ;;  %s207_s12 = smov [#allocation3]   ;;  %s19_s11 = int_to_ptr.hbm [resolvable:$true] %s18_s11 }
   0x3   :  { %s20_s13 = sshll.u32 %s207_s12, 4  ;;  %s35_s16 = sshll.u32 %s246_s1, 4  ;;  %s21_s13 = int_to_ptr.vmem [resolvable:$true] %s20_s13  ;;  %s36_s16 = int_to_ptr.hbm [resolvable:$true] %s35_s16 }
   0x4   :  { %s208_s17 = smov 128   ;;  %s209_s18 = smov 8  }
   0x5   :  { %26 = dma.hbm_to_vmem [thread:$0]  %s19_s11, 256, %s21_s13, [#allocation4], %s208_s17, %s208_s17, %s209_s18  }
   0x6   :  { %s210_s19 = smov [#allocation6]  }
   0x7   :  { %s37_s20 = sshll.u32 %s210_s19, 4  ;;  %s38_s20 = int_to_ptr.vmem [resolvable:$true] %s37_s20 }
   0x8   :  { %43 = dma.hbm_to_vmem [thread:$0]  %s36_s16, 256, %s38_s20, [#allocation7], %s208_s17, %s208_s17, %s209_s18  }
   0x9   :  { %201 = dma.done.wait [#allocation4], 256  }
   0xa   :  { %202 = vsyncadd [#allocation4], 4294967040 }
   0xb   :  { %203 = dma.done.wait [#allocation7], 256  }
   0xc   :  { %204 = vsyncadd [#allocation7], 4294967040  ;;  %v64_v0 = vld [vmem:[#allocation3] sm:$0xff]  ;;  %v65_v1 = vld [vmem:[#allocation3 + $0x8] sm:$0xff]  ;;  %s211_s0 = smov [#allocation8]   ;;  %s110_s23 = sshll.u32 %s247_s2, 4  ;;  %s111_s23 = int_to_ptr.hbm [resolvable:$true] %s110_s23 }
   0xd   :  { %v66_v2 = vld [vmem:[#allocation6] sm:$0xff]  ;;  %v67_v3 = vld [vmem:[#allocation6 + $0x8] sm:$0xff]  ;;  %v85_v6 = vadd.f32 %v65_v1, %v64_v0  ;;  %s108_s1 = sshll.u32 %s211_s0, 4  ;;  %s109_s1 = int_to_ptr.vmem [resolvable:$true] %s108_s1 }
   0xe   :  { %v68_v4 = vsub.f32 %v64_v0, %v66_v2  ;;  %v78_v5 = vmul.f32 %v66_v2, %v64_v0  ;;  %v69_v7 = vsub.f32 %v65_v1, %v67_v3  ;;  %v79_v8 = vmul.f32 %v67_v3, %v65_v1 }
   0xf   :  { %v90_v9 = vadd.f32 %v67_v3, %v66_v2  ;;  %102 = vst [vmem:[#allocation8 + $0x10] sm:$0xff] %v85_v6 }
  0x10   :  { %v71_v10 = vmul.f32 %v68_v4, %v68_v4  ;;  %v72_v11 = vmul.f32 %v69_v7, %v69_v7  ;;  %v80_v12 = vadd.f32 %v79_v8, %v78_v5 }
  0x11   :  { %103 = vst [vmem:[#allocation8 + $0x18] sm:$0xff] %v90_v9 }
  0x12   :  { %v73_v13 = vadd.f32 %v72_v11, %v71_v10  ;;  %101 = vst [vmem:[#allocation8 + $0x8] sm:$0xff] %v80_v12 }
  0x14   :  { %100 = vst [vmem:[#allocation8] sm:$0xff] %v73_v13 }
  0x15   :  { %116 = dma.vmem_to_hbm [thread:$0]  %s109_s1, 512, %s111_s23, [#allocation5], %s208_s17, %s208_s17, %s209_s18  }
  0x16   :  { %205 = dma.done.wait [#allocation5], 512  }
  0x17   :  { %206 = vsyncadd [#allocation5], 4294966784 }
  0x18   :  { %121 = vsyncpa [#allocation4], 1 }
  0x19   :  { %122 = vsyncpa [#allocation7], 1 }
  0x1a   :  { %123 = vsyncpa [#allocation5], 1 }

</bundles_post_ra>
